<compile_context>
chip_gen: v5e
topology: v5e:2x2
jax: 0.10.0
libtpu: 0.0.40
codegen_flags: <defaults>
</compile_context>

<pallas_src>
import jax
import jax.numpy as jnp
from jax import lax
from jax.experimental import pallas as pl
from jax.experimental.pallas import tpu as pltpu


def _round_up(a: int, b: int) -> int:
    return ((a + b - 1) // b) * b


def _lora_kernel_inplace(x_ref, w_ref, a_ref, xb_ref, bias_ref, o_ref):
    """f32 output: accumulate directly into the k-resident output tile."""
    k = pl.program_id(2)

    @pl.when(k == 0)
    def _():
        o_ref[...] = jnp.zeros_like(o_ref)

    # Base path: x @ W^T (contract last dims; W stays in (out, in) layout).
    o_ref[...] += lax.dot_general(
        x_ref[...], w_ref[...],
        dimension_numbers=(((1,), (1,)), ((), ())),
        preferred_element_type=jnp.float32).astype(o_ref.dtype)

    @pl.when(k == pl.num_programs(2) - 1)
    def _():
        # LoRA finalize: (x @ B^T) @ A^T, then bias -- once per (i, j) tile.
        delta = lax.dot_general(
            xb_ref[...], a_ref[...],
            dimension_numbers=(((1,), (1,)), ((), ())),
            preferred_element_type=jnp.float32)
        o_ref[...] += (delta + bias_ref[...].astype(jnp.float32)).astype(
            o_ref.dtype)


def _lora_kernel_scratch(x_ref, w_ref, a_ref, xb_ref, bias_ref, o_ref,
                         acc_ref):
    """Non-f32 output (e.g. bf16): f32 VMEM accumulator, cast on finalize."""
    k = pl.program_id(2)

    @pl.when(k == 0)
    def _():
        acc_ref[...] = jnp.zeros_like(acc_ref)

    acc_ref[...] += lax.dot_general(
        x_ref[...], w_ref[...],
        dimension_numbers=(((1,), (1,)), ((), ())),
        preferred_element_type=jnp.float32)

    @pl.when(k == pl.num_programs(2) - 1)
    def _():
        delta = lax.dot_general(
            xb_ref[...], a_ref[...],
            dimension_numbers=(((1,), (1,)), ((), ())),
            preferred_element_type=jnp.float32)
        y = acc_ref[...] + delta + bias_ref[...].astype(jnp.float32)
        o_ref[...] = y.astype(o_ref.dtype)


def lora_attention_forward(x, W, bias, A, B, *, tm=512, tn=512, tk=1024,
                           compute_dtype=None):
    """x: (batch, seq, in_f); W: (out_f, in_f); bias: (out_f,) or None
       A: (out_f, rank);      B: (rank, in_f)   ->  (batch, seq, out_f)"""
    batch, seq, in_f = x.shape
    out_f, _ = W.shape
    rank = A.shape[1]
    M = batch * seq

    out_dtype = jnp.dtype(x.dtype)
    cdtype = jnp.dtype(compute_dtype) if compute_dtype is not None else out_dtype

    if bias is None:
        bias = jnp.zeros((out_f,), dtype=out_dtype)

    # Clamp tiles to (padded) problem size; keep alignment: tm % 8 == 0,
    # tn / tk multiples of 128 (lane-dense output, aligned K slices).
    tm = min(tm, _round_up(M, 8))
    tn = min(tn, _round_up(out_f, 128))
    tk = min(tk, _round_up(in_f, 128))

    # Dtype-aware rank padding (native sublane packing: 8 / 16 / 32).
    sub = max(8, 32 // jnp.dtype(cdtype).itemsize)
    rank_p = _round_up(max(rank, sub), sub)

    M_p = _round_up(M, tm)
    out_p = _round_up(out_f, tn)
    in_p = _round_up(in_f, tk)

    # Megacore occupancy (v7x, 2 TCs): if the M grid collapses to one tile,
    # shrink tn so at least two parallel j tiles exist.
    if (M_p // tm) == 1:
        while tn > 128 and (out_p // tn) < 2:
            tn = _round_up(tn // 2, 128)
            out_p = _round_up(out_f, tn)

    x2d = x.reshape(M, in_f)
    # LoRA stage 1 hoisted out of the kernel: XB = x @ B^T, tiny (M, rank).
    xb = jnp.einsum("mk,rk->mr", x2d, B,
                    preferred_element_type=jnp.float32).astype(cdtype)

    x_p = jnp.pad(x2d.astype(cdtype), ((0, M_p - M), (0, in_p - in_f)))
    W_p = jnp.pad(W.astype(cdtype), ((0, out_p - out_f), (0, in_p - in_f)))
    A_p = jnp.pad(A.astype(cdtype), ((0, out_p - out_f), (0, rank_p - rank)))
    XB_p = jnp.pad(xb, ((0, M_p - M), (0, rank_p - rank)))
    bias_p = jnp.pad(bias.astype(jnp.float32), (0, out_p - out_f)).reshape(1, out_p)

    grid = (M_p // tm, out_p // tn, in_p // tk)

    inplace = out_dtype == jnp.float32
    kernel = _lora_kernel_inplace if inplace else _lora_kernel_scratch
    scratch = [] if inplace else [pltpu.VMEM((tm, tn), jnp.float32)]

    in_isz = jnp.dtype(cdtype).itemsize
    out_isz = out_dtype.itemsize
    # Double-buffered inputs/output + (optional) resident f32 accumulator.
    vmem_est = (2 * (tm * tk + tn * tk + tn * rank_p + tm * rank_p + tn) * in_isz
                + 2 * tm * tn * out_isz
                + (0 if inplace else tm * tn * 4))
    vmem_limit = int(min(max(vmem_est * 3 // 2, 32 * 1024 * 1024),
                         64 * 1024 * 1024))

    flops = 2 * M * in_f * out_f + 2 * M * rank * out_f
    bytes_accessed = (x_p.size * in_isz + W_p.size * in_isz
                      + A_p.size * in_isz + XB_p.size * in_isz
                      + bias_p.size * 4 + M_p * out_p * out_isz)

    y_p = pl.pallas_call(
        kernel,
        out_shape=jax.ShapeDtypeStruct((M_p, out_p), out_dtype),
        grid_spec=pltpu.PrefetchScalarGridSpec(
            num_scalar_prefetch=0,
            grid=grid,
            in_specs=[
                pl.BlockSpec((tm, tk), lambda i, j, k: (i, k)),        # x
                pl.BlockSpec((tn, tk), lambda i, j, k: (j, k)),        # W
                pl.BlockSpec((tn, rank_p), lambda i, j, k: (j, 0)),    # A
                pl.BlockSpec((tm, rank_p), lambda i, j, k: (i, 0)),    # XB
                pl.BlockSpec((1, tn), lambda i, j, k: (0, j)),         # bias
            ],
            out_specs=pl.BlockSpec((tm, tn), lambda i, j, k: (i, j)),
            scratch_shapes=scratch,
        ),
        compiler_params=pltpu.CompilerParams(
            dimension_semantics=("parallel", "parallel", "arbitrary"),
            vmem_limit_bytes=vmem_limit),
        cost_estimate=pl.CostEstimate(
            flops=flops, transcendentals=0, bytes_accessed=bytes_accessed),
    )(x_p, W_p, A_p, XB_p, bias_p)

    return y_p[:M, :out_f].reshape(batch, seq, out_f)


if __name__ == "__main__":
    # Small shapes consistent with a Linear base layer + LoRA:
    batch, seq = 2, 8
    in_features, out_features, rank = 32, 32, 4

    key = jax.random.PRNGKey(0)
    kx, kw, kb, ka, kbb = jax.random.split(key, 5)

    x = jax.random.normal(kx, (batch, seq, in_features), dtype=jnp.float32)
    # Deterministic "base_layer" (nn.Linear-style) parameters:
    W = jax.random.normal(kw, (out_features, in_features), dtype=jnp.float32) * 0.1
    bias = jax.random.normal(kb, (out_features,), dtype=jnp.float32) * 0.1
    # LoRA parameters: randn * 0.01, matching the module __init__:
    A = jax.random.normal(ka, (out_features, rank), dtype=jnp.float32) * 0.01
    B = jax.random.normal(kbb, (rank, in_features), dtype=jnp.float32) * 0.01

    y = lora_attention_forward(x, W, bias, A, B)
    y = jax.block_until_ready(y)

    # Reference check against plain JAX (same math as F.linear(x, W + A@B, bias)).
    y_ref = jnp.einsum("bsi,oi->bso", x, W + A @ B) + bias
    assert y.shape == (batch, seq, out_features)
    assert jnp.allclose(y, y_ref, atol=1e-4, rtol=1e-4), "mismatch vs reference"

    print("KERNEL_OK")
</pallas_src>

<mosaic_0001>
module attributes {stable_mosaic.version = 11 : i64} {
  func.func @_lora_kernel_inplace(%arg0: i32, %arg1: i32, %arg2: i32, %arg3: memref<16x128xf32, #tpu.memory_space<vmem>>, %arg4: memref<128x128xf32, #tpu.memory_space<vmem>>, %arg5: memref<128x8xf32, #tpu.memory_space<vmem>>, %arg6: memref<16x8xf32, #tpu.memory_space<vmem>>, %arg7: memref<1x128xf32, #tpu.memory_space<vmem>>, %arg8: memref<16x128xf32, #tpu.memory_space<vmem>>) attributes {dimension_semantics = [#tpu.dimension_semantics<parallel>, #tpu.dimension_semantics<parallel>, #tpu.dimension_semantics<arbitrary>], iteration_bounds = array<i64: 1, 1, 1>, scalar_prefetch = 0 : i64, scratch_operands = 0 : i64, tpu.core_type = #tpu.core_type<tc>, window_params = [{transform_indices = @transform_0, window_bounds = array<i64: 16, 128>}, {transform_indices = @transform_1, window_bounds = array<i64: 128, 128>}, {transform_indices = @transform_2, window_bounds = array<i64: 128, 8>}, {transform_indices = @transform_3, window_bounds = array<i64: 16, 8>}, {transform_indices = @transform_4, window_bounds = array<i64: 1, 128>}, {transform_indices = @transform_5, window_bounds = array<i64: 16, 128>}]} {
    %c0_i32 = arith.constant 0 : i32
    %0 = arith.cmpi eq, %arg2, %c0_i32 : i32
    %1 = arith.extui %0 : i1 to i32
    %c0_i32_0 = arith.constant 0 : i32
    %2 = arith.cmpi ne, %1, %c0_i32_0 : i32
    scf.if %2 {
      %cst_10 = arith.constant 0.000000e+00 : f32
      %12 = vector.broadcast %cst_10 : f32 to vector<16x128xf32>
      %c0_11 = arith.constant 0 : index
      %c0_12 = arith.constant 0 : index
      %13 = vector.load %arg8[%c0_11, %c0_12] : memref<16x128xf32, #tpu.memory_space<vmem>>, vector<16x128xf32>
      tpu.vector_store %arg8[%c0_11, %c0_12], %12 {strides = array<i32>} : memref<16x128xf32, #tpu.memory_space<vmem>>, vector<16x128xf32>,
    } else {
    }
    %c0 = arith.constant 0 : index
    %c0_1 = arith.constant 0 : index
    %3 = vector.load %arg8[%c0, %c0_1] : memref<16x128xf32, #tpu.memory_space<vmem>>, vector<16x128xf32>
    %c0_2 = arith.constant 0 : index
    %c0_3 = arith.constant 0 : index
    %4 = vector.load %arg3[%c0_2, %c0_3] : memref<16x128xf32, #tpu.memory_space<vmem>>, vector<16x128xf32>
    %c0_4 = arith.constant 0 : index
    %c0_5 = arith.constant 0 : index
    %5 = vector.load %arg4[%c0_4, %c0_5] : memref<128x128xf32, #tpu.memory_space<vmem>>, vector<128x128xf32>
    %cst = arith.constant dense<0.000000e+00> : vector<16x128xf32>
    %6 = tpu.matmul %4, %5, %cst {dimension_numbers = #tpu.dot_dimension_numbers<[1], [1], [0], [0], [0, 0, 1, 0], [], []>} : vector<16x128xf32>, vector<128x128xf32>, vector<16x128xf32> -> vector<16x128xf32>
    %7 = arith.addf %3, %6 : vector<16x128xf32>
    %c0_6 = arith.constant 0 : index
    %c0_7 = arith.constant 0 : index
    %8 = vector.load %arg8[%c0_6, %c0_7] : memref<16x128xf32, #tpu.memory_space<vmem>>, vector<16x128xf32>
    tpu.vector_store %arg8[%c0_6, %c0_7], %7 {strides = array<i32>} : memref<16x128xf32, #tpu.memory_space<vmem>>, vector<16x128xf32>,
    %c0_i32_8 = arith.constant 0 : i32
    %9 = arith.cmpi eq, %arg2, %c0_i32_8 : i32
    %10 = arith.extui %9 : i1 to i32
    %c0_i32_9 = arith.constant 0 : i32
    %11 = arith.cmpi ne, %10, %c0_i32_9 : i32
    scf.if %11 {
      %c0_10 = arith.constant 0 : index
      %c0_11 = arith.constant 0 : index
      %12 = vector.load %arg6[%c0_10, %c0_11] : memref<16x8xf32, #tpu.memory_space<vmem>>, vector<16x8xf32>
      %c0_12 = arith.constant 0 : index
      %c0_13 = arith.constant 0 : index
      %13 = vector.load %arg5[%c0_12, %c0_13] : memref<128x8xf32, #tpu.memory_space<vmem>>, vector<128x8xf32>
      %cst_14 = arith.constant dense<0.000000e+00> : vector<16x128xf32>
      %14 = tpu.matmul %12, %13, %cst_14 {dimension_numbers = #tpu.dot_dimension_numbers<[1], [1], [0], [0], [0, 0, 1, 0], [], []>} : vector<16x8xf32>, vector<128x8xf32>, vector<16x128xf32> -> vector<16x128xf32>
      %c0_15 = arith.constant 0 : index
      %c0_16 = arith.constant 0 : index
      %15 = vector.load %arg8[%c0_15, %c0_16] : memref<16x128xf32, #tpu.memory_space<vmem>>, vector<16x128xf32>
      %c0_17 = arith.constant 0 : index
      %c0_18 = arith.constant 0 : index
      %16 = vector.load %arg7[%c0_17, %c0_18] : memref<1x128xf32, #tpu.memory_space<vmem>>, vector<1x128xf32>
      %17 = vector.broadcast %16 : vector<1x128xf32> to vector<16x128xf32>
      %18 = arith.addf %14, %17 : vector<16x128xf32>
      %19 = arith.addf %15, %18 : vector<16x128xf32>
      %c0_19 = arith.constant 0 : index
      %c0_20 = arith.constant 0 : index
      %20 = vector.load %arg8[%c0_19, %c0_20] : memref<16x128xf32, #tpu.memory_space<vmem>>, vector<16x128xf32>
      tpu.vector_store %arg8[%c0_19, %c0_20], %19 {strides = array<i32>} : memref<16x128xf32, #tpu.memory_space<vmem>>, vector<16x128xf32>,
    } else {
    }
    return
  }
  func.func @transform_0(%arg0: i32, %arg1: i32, %arg2: i32) -> (i32, i32) {
    %c0_i32 = arith.constant 0 : i32
    return %arg0, %arg2 : i32, i32
  }
  func.func @transform_1(%arg0: i32, %arg1: i32, %arg2: i32) -> (i32, i32) {
    %c0_i32 = arith.constant 0 : i32
    return %arg1, %arg2 : i32, i32
  }
  func.func @transform_2(%arg0: i32, %arg1: i32, %arg2: i32) -> (i32, i32) {
    %c0_i32 = arith.constant 0 : i32
    %c0_i32_0 = arith.constant 0 : i32
    return %arg1, %c0_i32 : i32, i32
  }
  func.func @transform_3(%arg0: i32, %arg1: i32, %arg2: i32) -> (i32, i32) {
    %c0_i32 = arith.constant 0 : i32
    %c0_i32_0 = arith.constant 0 : i32
    return %arg0, %c0_i32 : i32, i32
  }
  func.func @transform_4(%arg0: i32, %arg1: i32, %arg2: i32) -> (i32, i32) {
    %c0_i32 = arith.constant 0 : i32
    %c0_i32_0 = arith.constant 0 : i32
    return %c0_i32, %arg1 : i32, i32
  }
  func.func @transform_5(%arg0: i32, %arg1: i32, %arg2: i32) -> (i32, i32) {
    %c0_i32 = arith.constant 0 : i32
    return %arg0, %arg1 : i32, i32
  }
}

</mosaic_0001>

<bundles_post_ra>
// kernel: tpu_custom_call.1
= control target key start
LH: loop header
LB: loop body
LE: loop exit
PB: predicated region body
PF: predicated region fallthrough
CT: control target
= control target key end

     0   :  { %vm101_vm0 = vcmask 64512   ;;  %s463_s0 = inlined_call_operand.vmem [shape: f32[16,128], index: 0, kind: input, shape index: {}]   ;;  %s464_s1 = inlined_call_operand.vmem [shape: f32[128,128], index: 1, kind: input, shape index: {}]   ;;  %s465_s2 = inlined_call_operand.vmem [shape: f32[128,8], index: 2, kind: input, shape index: {}]   ;;  %s466_s3 = inlined_call_operand.vmem [shape: f32[16,8], index: 3, kind: input, shape index: {}]   ;;  %s467_s4 = inlined_call_operand.vmem [shape: f32[1,128], index: 4, kind: input, shape index: {}]   ;;  %s468_s5 = inlined_call_operand.hbm [shape: f32[16,128], index: 5, kind: output, shape index: {}]  }
   0x1   :  { %v46_v0 = vld [vmem:[%s464_s1 + $0x78] sm:$0xff]  ;;  %v45_v2 = vld [vmem:[%s464_s1 + $0x70] sm:$0xff]  ;;  %v44_v4 = vld [vmem:[%s464_s1 + $0x68] sm:$0xff] }
   0x2   :  { %219 = vmatpush.xpose.msra.mxu2 %v46_v0  ;;  %47 = vmatpush.xpose.msra.mxu0 %v46_v0  ;;  %v94_v1 = vld [vmem:[%s465_s2 + $0x78] sm:$0xff]  ;;  %v93_v3 = vld [vmem:[%s465_s2 + $0x70] sm:$0xff]  ;;  %v92_v5 = vld [vmem:[%s465_s2 + $0x68] sm:$0xff] }
   0x3   :  { %235 = vmatpush.xpose.msk.msra.mxu3 %vm101_vm0, %v94_v1  ;;  %201 = vmatpush.xpose.msk.msra.mxu1 %vm101_vm0, %v94_v1 }
   0x6   :  { %220 = vmatpush.xpose.msra.mxu2 %v45_v2  ;;  %48 = vmatpush.xpose.msra.mxu0 %v45_v2 }
   0x7   :  { %236 = vmatpush.xpose.msk.msra.mxu3 %vm101_vm0, %v93_v3  ;;  %202 = vmatpush.xpose.msk.msra.mxu1 %vm101_vm0, %v93_v3 }
   0x8   :  { %10 = vsyncpa [#allocation3], 0  ;;  %v43_v6 = vld [vmem:[%s464_s1 + $0x60] sm:$0xff]  ;;  %v42_v8 = vld [vmem:[%s464_s1 + $0x58] sm:$0xff]  ;;  %s282_s14 = smov [#allocation2]   ;;  %s189_s17 = sshll.u32 %s468_s5, 4  ;;  %s190_s17 = int_to_ptr.hbm [resolvable:$true] %s189_s17 }
   0x9   :  { %v91_v7 = vld [vmem:[%s465_s2 + $0x60] sm:$0xff]  ;;  %v90_v9 = vld [vmem:[%s465_s2 + $0x58] sm:$0xff]  ;;  %v41_v10 = vld [vmem:[%s464_s1 + $0x50] sm:$0xff]  ;;  %s187_s15 = sshll.u32 %s282_s14, 4  ;;  %s283_s18 = smov 128   ;;  %s188_s15 = int_to_ptr.vmem [resolvable:$true] %s187_s15 }
   0xa   :  { %221 = vmatpush.xpose.msra.mxu2 %v44_v4  ;;  %49 = vmatpush.xpose.msra.mxu0 %v44_v4  ;;  %v89_v11 = vld [vmem:[%s465_s2 + $0x50] sm:$0xff]  ;;  %v40_v12 = vld [vmem:[%s464_s1 + $0x48] sm:$0xff]  ;;  %v39_v14 = vld [vmem:[%s464_s1 + $0x40] sm:$0xff] }
   0xb   :  { %237 = vmatpush.xpose.msk.msra.mxu3 %vm101_vm0, %v92_v5  ;;  %203 = vmatpush.xpose.msk.msra.mxu1 %vm101_vm0, %v92_v5  ;;  %v88_v13 = vld [vmem:[%s465_s2 + $0x48] sm:$0xff]  ;;  %v87_v15 = vld [vmem:[%s465_s2 + $0x40] sm:$0xff]  ;;  %v38_v16 = vld [vmem:[%s464_s1 + $0x38] sm:$0xff] }
   0xc   :  { %v86_v17 = vld [vmem:[%s465_s2 + $0x38] sm:$0xff]  ;;  %v37_v18 = vld [vmem:[%s464_s1 + $0x30] sm:$0xff]  ;;  %v36_v20 = vld [vmem:[%s464_s1 + $0x28] sm:$0xff] }
   0xd   :  { %v85_v19 = vld [vmem:[%s465_s2 + $0x30] sm:$0xff]  ;;  %v84_v21 = vld [vmem:[%s465_s2 + $0x28] sm:$0xff]  ;;  %v35_v22 = vld [vmem:[%s464_s1 + $0x20] sm:$0xff] }
   0xe   :  { %222 = vmatpush.xpose.msra.mxu2 %v43_v6  ;;  %50 = vmatpush.xpose.msra.mxu0 %v43_v6  ;;  %v83_v23 = vld [vmem:[%s465_s2 + $0x20] sm:$0xff]  ;;  %v34_v24 = vld [vmem:[%s464_s1 + $0x18] sm:$0xff]  ;;  %v33_v26 = vld [vmem:[%s464_s1 + $0x10] sm:$0xff] }
   0xf   :  { %238 = vmatpush.xpose.msk.msra.mxu3 %vm101_vm0, %v91_v7  ;;  %204 = vmatpush.xpose.msk.msra.mxu1 %vm101_vm0, %v91_v7  ;;  %v82_v25 = vld [vmem:[%s465_s2 + $0x18] sm:$0xff]  ;;  %v81_v27 = vld [vmem:[%s465_s2 + $0x10] sm:$0xff]  ;;  %v32_v28 = vld [vmem:[%s464_s1 + $0x8] sm:$0xff] }
  0x10   :  { %v80_v29 = vld [vmem:[%s465_s2 + $0x8] sm:$0xff]  ;;  %v31_v30 = vld [vmem:[%s464_s1] sm:$0xff] }
  0x11   :  { %v79_v31 = vld [vmem:[%s465_s2] sm:$0xff]  ;;  %v30_v32 = vld [vmem:[%s463_s0 + $0x8] sm:$0xff] }
  0x12   :  { %223 = vmatpush.xpose.msra.mxu2 %v42_v8  ;;  %51 = vmatpush.xpose.msra.mxu0 %v42_v8  ;;  %v29_v33 = vld [vmem:[%s463_s0] sm:$0xff]  ;;  %v78_v34 = vld [vmem:[%s466_s3 + $0x8] sm:$0xff] }
  0x13   :  { %239 = vmatpush.xpose.msk.msra.mxu3 %vm101_vm0, %v90_v9  ;;  %205 = vmatpush.xpose.msk.msra.mxu1 %vm101_vm0, %v90_v9  ;;  %v77_v35 = vld [vmem:[%s466_s3] sm:$0xff] }
  0x14   :  { %v255_v36 = vld [vmem:[%s467_s4] ss:$0 sm:$0xff]  ;;  %s284_s4 = smov 8  }
  0x16   :  { %224 = vmatpush.xpose.msra.mxu2 %v41_v10  ;;  %52 = vmatpush.xpose.msra.mxu0 %v41_v10 }
  0x17   :  { %240 = vmatpush.xpose.msk.msra.mxu3 %vm101_vm0, %v89_v11  ;;  %206 = vmatpush.xpose.msk.msra.mxu1 %vm101_vm0, %v89_v11 }
  0x1a   :  { %225 = vmatpush.xpose.msra.mxu2 %v40_v12  ;;  %53 = vmatpush.xpose.msra.mxu0 %v40_v12 }
  0x1b   :  { %241 = vmatpush.xpose.msk.msra.mxu3 %vm101_vm0, %v88_v13  ;;  %207 = vmatpush.xpose.msk.msra.mxu1 %vm101_vm0, %v88_v13 }
  0x1e   :  { %226 = vmatpush.xpose.msra.mxu2 %v39_v14  ;;  %54 = vmatpush.xpose.msra.mxu0 %v39_v14 }
  0x1f   :  { %242 = vmatpush.xpose.msk.msra.mxu3 %vm101_vm0, %v87_v15  ;;  %208 = vmatpush.xpose.msk.msra.mxu1 %vm101_vm0, %v87_v15 }
  0x22   :  { %227 = vmatpush.xpose.msra.mxu2 %v38_v16  ;;  %55 = vmatpush.xpose.msra.mxu0 %v38_v16 }
  0x23   :  { %243 = vmatpush.xpose.msk.msra.mxu3 %vm101_vm0, %v86_v17  ;;  %209 = vmatpush.xpose.msk.msra.mxu1 %vm101_vm0, %v86_v17 }
  0x26   :  { %228 = vmatpush.xpose.msra.mxu2 %v37_v18  ;;  %56 = vmatpush.xpose.msra.mxu0 %v37_v18 }
  0x27   :  { %244 = vmatpush.xpose.msk.msra.mxu3 %vm101_vm0, %v85_v19  ;;  %210 = vmatpush.xpose.msk.msra.mxu1 %vm101_vm0, %v85_v19 }
  0x2a   :  { %229 = vmatpush.xpose.msra.mxu2 %v36_v20  ;;  %57 = vmatpush.xpose.msra.mxu0 %v36_v20 }
  0x2b   :  { %245 = vmatpush.xpose.msk.msra.mxu3 %vm101_vm0, %v84_v21  ;;  %211 = vmatpush.xpose.msk.msra.mxu1 %vm101_vm0, %v84_v21 }
  0x2e   :  { %230 = vmatpush.xpose.msra.mxu2 %v35_v22  ;;  %58 = vmatpush.xpose.msra.mxu0 %v35_v22 }
  0x2f   :  { %246 = vmatpush.xpose.msk.msra.mxu3 %vm101_vm0, %v83_v23  ;;  %212 = vmatpush.xpose.msk.msra.mxu1 %vm101_vm0, %v83_v23 }
  0x32   :  { %231 = vmatpush.xpose.msra.mxu2 %v34_v24  ;;  %59 = vmatpush.xpose.msra.mxu0 %v34_v24 }
  0x33   :  { %247 = vmatpush.xpose.msk.msra.mxu3 %vm101_vm0, %v82_v25  ;;  %213 = vmatpush.xpose.msk.msra.mxu1 %vm101_vm0, %v82_v25 }
  0x36   :  { %232 = vmatpush.xpose.msra.mxu2 %v33_v26  ;;  %60 = vmatpush.xpose.msra.mxu0 %v33_v26 }
  0x37   :  { %248 = vmatpush.xpose.msk.msra.mxu3 %vm101_vm0, %v81_v27  ;;  %214 = vmatpush.xpose.msk.msra.mxu1 %vm101_vm0, %v81_v27 }
  0x3a   :  { %233 = vmatpush.xpose.msra.mxu2 %v32_v28  ;;  %61 = vmatpush.xpose.msra.mxu0 %v32_v28 }
  0x3b   :  { %249 = vmatpush.xpose.msk.msra.mxu3 %vm101_vm0, %v80_v29  ;;  %215 = vmatpush.xpose.msk.msra.mxu1 %vm101_vm0, %v80_v29 }
  0x3e   :  { %234 = vmatpush.xpose.msra.mxu2 %v31_v30  ;;  %62 = vmatpush.xpose.msra.mxu0 %v31_v30 }
  0x3f   :  { %250 = vmatpush.xpose.msk.msra.mxu3 %vm101_vm0, %v79_v31  ;;  %216 = vmatpush.xpose.msk.msra.mxu1 %vm101_vm0, %v79_v31 }
  0x41   :  { %66 = vmatmul.f32.vlgmr.msra.gmra.mxu2 %v30_v32  ;;  %63 = vmatmul.f32.vlgmr.msra.gmra.mxu0 %v29_v33 }
  0x42   :  { %218 = vmatmul.msk.f32.vlgmr.msra.gmra.mxu3 %vm101_vm0, %v78_v34  ;;  %217 = vmatmul.msk.f32.vlgmr.msra.gmra.mxu1 %vm101_vm0, %v77_v35 }
  0xbe   :  { %v64_v37 = vpop.f32.mrf.mxu0 }
  0xbf   :  { %v173_v38 = vpop.f32.mrf.mxu1 }
  0xc0   :  { %v174_v39 = vadd.f32 %v255_v36, %v173_v38 }
  0xc2   :  { %v179_v40 = vadd.f32 %v174_v39, %v64_v37 }
  0xc4   :  { %v67_v41 = vpop.f32.mrf.mxu2  ;;  %181 = vst [vmem:[#allocation2] sm:$0xff] %v179_v40 }
  0xc5   :  { %v176_v42 = vpop.f32.mrf.mxu3 }
  0xc6   :  { %v177_v43 = vadd.f32 %v255_v36, %v176_v42 }
  0xc8   :  { %v180_v44 = vadd.f32 %v177_v43, %v67_v41 }
  0xca   :  { %182 = vst [vmem:[#allocation2 + $0x8] sm:$0xff] %v180_v44 }
  0xcb   :  { %195 = dma.vmem_to_hbm [thread:$0]  %s188_s15, 256, %s190_s17, [#allocation3], %s283_s18, %s283_s18, %s284_s4  }
  0xcc   :  { %280 = dma.done.wait [#allocation3], 256  }
  0xcd   :  { %281 = vsyncadd [#allocation3], 4294967040 }
  0xce   :  { %200 = vsyncpa [#allocation3], 1 }

</bundles_post_ra>
